<compile_context>
chip_gen: v5e
topology: v5e:2x2
jax: 0.10.0
libtpu: 0.0.40
codegen_flags: <defaults>
</compile_context>

<pallas_src>
import functools

import jax
import jax.numpy as jnp
from jax.experimental import pallas as pl
from jax.experimental.pallas import tpu as pltpu


def _nw_kernel(w_ref, q_ref, k_ref, v_ref, o_ref, *, n_q, tq):
    # w_ref: SMEM (1,); q_ref: (TQ, 1); k_ref/v_ref: (TQ, N_KV); o_ref: (TQ, 1)
    w = w_ref[0]                        # cheap scalar-unit load from SMEM
    c = 0.5 * w * w                     # fold -((q-k)*w)**2/2 == -(q-k)**2 * c

    q = q_ref[...]                      # (TQ, 1) broadcasts across the kv lanes
    k = k_ref[...]                      # (TQ, N_KV)
    v = v_ref[...]                      # (TQ, N_KV)

    d = q - k
    scores = -(d * d) * c               # (TQ, N_KV), all <= 0 for valid rows

    if n_q % tq != 0:
        # Final grid step is a partial block: the padded tail rows hold undefined
        # data, so neutralize them (scores=0 -> uniform softmax over zero values).
        # Rows never mix (elementwise + lane-axis reduces only) and the OOB output
        # rows are dropped by the pipeline; this just keeps Inf/NaN garbage out.
        rows = pl.program_id(0) * tq + jax.lax.broadcasted_iota(
            jnp.int32, scores.shape, 0)
        valid = rows < n_q
        scores = jnp.where(valid, scores, 0.0)
        v = jnp.where(valid, v, 0.0)

    # Numerically-stable row-wise softmax-weighted sum along the lane (kv) axis.
    m = jnp.max(scores, axis=1, keepdims=True)
    e = jnp.exp(scores - m)
    num = jnp.sum(e * v, axis=1, keepdims=True)   # (TQ, 1)
    den = jnp.sum(e, axis=1, keepdims=True)       # (TQ, 1)

    # approx=True would use the idle EUP vrcp slot but may not hold the 1e-5
    # comparison against the exact-division reference; keep exact reciprocal.
    o_ref[...] = num * pl.reciprocal(den, approx=False)


def _round_up(x, m):
    return ((x + m - 1) // m) * m


def _vmem_budget_bytes():
    """Generation-aware VMEM budget: ~48 MiB on v7x (64 MiB/TC), 64 MiB on v5e/v6e."""
    try:
        cap = int(pltpu.get_tpu_info().vmem_capacity_bytes)
    except Exception:  # interpret mode / older jax: fall back to the v7x floor
        cap = 64 << 20
    return int(min(cap * 3 // 4, 64 << 20))


def _choose_tile_q(n_q, n_kv, vmem_budget):
    """Pick query-tile TQ (multiple of 8, capped at 1024).

    VMEM footprint ~= 2 tiled inputs x 2 pipeline buffers x (TQ x n_kv x 4B) plus
    the tiny q/out tiles, so each (TQ, n_kv) tile gets ~1/6 of the VMEM budget.
    """
    full = _round_up(max(n_q, 1), 8)
    tile_budget = max(vmem_budget // 6, 64 << 10)
    cap = (tile_budget // (4 * max(n_kv, 1))) // 8 * 8
    cap = max(8, min(1024, cap))
    return min(full, cap)


def nw_kernel_regression(w, queries, keys, values):
    """Pallas wrapper. queries: (n_q,), keys/values: (n_q, n_kv), w: (1,). -> (n_q,)."""
    n_q, n_kv = keys.shape
    vmem_budget = _vmem_budget_bytes()
    tq = _choose_tile_q(n_q, n_kv, vmem_budget)
    n_tiles = pl.cdiv(n_q, tq)

    q2 = queries.reshape(n_q, 1).astype(jnp.float32)
    k2 = keys.astype(jnp.float32)
    v2 = values.astype(jnp.float32)
    w1 = w.reshape(1).astype(jnp.float32)

    kernel = functools.partial(_nw_kernel, n_q=n_q, tq=tq)

    cost = pl.CostEstimate(
        flops=6 * n_q * n_kv,
        transcendentals=n_q * n_kv,
        bytes_accessed=4 * (2 * n_q * n_kv + 2 * n_q),
    )

    out = pl.pallas_call(
        kernel,
        out_shape=jax.ShapeDtypeStruct((n_q, 1), jnp.float32),
        grid=(n_tiles,),
        in_specs=[
            pl.BlockSpec(memory_space=pltpu.MemorySpace.SMEM),   # w: scalar in SMEM
            pl.BlockSpec((tq, 1), lambda i: (i, 0)),             # queries tile
            pl.BlockSpec((tq, n_kv), lambda i: (i, 0)),          # keys tile
            pl.BlockSpec((tq, n_kv), lambda i: (i, 0)),          # values tile
        ],
        out_specs=pl.BlockSpec((tq, 1), lambda i: (i, 0)),
        compiler_params=pltpu.CompilerParams(
            dimension_semantics=("parallel",),
            vmem_limit_bytes=vmem_budget,
        ),
        cost_estimate=cost,
    )(w1, q2, k2, v2)
    return out.reshape(-1)


def f(x):
    return 2.0 * jnp.sin(x) + x ** 0.8


def reference(w, queries, keys, values):
    """Pure-JAX reference matching the PyTorch forward."""
    n_q, n_kv = keys.shape
    q = jnp.repeat(queries, n_kv).reshape(n_q, n_kv)
    scores = -((q - keys) * w[0]) ** 2 / 2.0
    attn = jax.nn.softmax(scores, axis=1)
    return jnp.sum(attn * values, axis=1)


if __name__ == "__main__":
    key = jax.random.PRNGKey(0)
    k_w, k_xtrain, k_noise, k_q2, k_k2, k_v2 = jax.random.split(key, 6)

    # --- Case 1: original script's shapes (50 test queries, 50 train points) ---
    n_train = 50
    x_train = jnp.sort(jax.random.uniform(k_xtrain, (n_train,), jnp.float32) * 5.0)
    y_train = f(x_train) + 0.5 * jax.random.normal(k_noise, (n_train,), jnp.float32)

    x_test = jnp.arange(0, 5, 0.1, dtype=jnp.float32)        # (50,)
    n_test = x_test.shape[0]
    keys = jnp.tile(x_train[None, :], (n_test, 1))            # (50, 50)
    values = jnp.tile(y_train[None, :], (n_test, 1))          # (50, 50)
    w = jax.random.uniform(k_w, (1,), jnp.float32)            # parameter ~ U[0,1)

    out = jax.block_until_ready(nw_kernel_regression(w, x_test, keys, values))
    ref = reference(w, x_test, keys, values)
    assert out.shape == (n_test,)
    assert jnp.allclose(out, ref, atol=1e-5, rtol=1e-5)

    # --- Case 2: multi-tile grid with a partial tail block (n_q % TQ != 0) ---
    n_q2, n_kv2 = 1100, 256
    q_big = jax.random.uniform(k_q2, (n_q2,), jnp.float32) * 5.0
    k_big = jax.random.uniform(k_k2, (n_q2, n_kv2), jnp.float32) * 5.0
    v_big = jax.random.normal(k_v2, (n_q2, n_kv2), jnp.float32)

    out2 = jax.block_until_ready(nw_kernel_regression(w, q_big, k_big, v_big))
    ref2 = reference(w, q_big, k_big, v_big)
    assert out2.shape == (n_q2,)
    assert jnp.allclose(out2, ref2, atol=1e-5, rtol=1e-5)

    print("KERNEL_OK")
</pallas_src>

<mosaic_0001>
module attributes {stable_mosaic.version = 11 : i64} {
  func.func @_nw_kernel(%arg0: i32, %arg1: memref<1xf32, #tpu.memory_space<smem>>, %arg2: memref<56x1xf32, #tpu.memory_space<vmem>>, %arg3: memref<56x50xf32, #tpu.memory_space<vmem>>, %arg4: memref<56x50xf32, #tpu.memory_space<vmem>>, %arg5: memref<56x1xf32, #tpu.memory_space<vmem>>) attributes {dimension_semantics = [#tpu.dimension_semantics<parallel>], iteration_bounds = array<i64: 1>, scalar_prefetch = 0 : i64, scratch_operands = 0 : i64, tpu.core_type = #tpu.core_type<tc>, window_params = [{transform_indices = @transform_0, window_bounds = array<i64: 1>}, {transform_indices = @transform_1, window_bounds = array<i64: 56, 1>}, {transform_indices = @transform_2, window_bounds = array<i64: 56, 50>}, {transform_indices = @transform_3, window_bounds = array<i64: 56, 50>}, {transform_indices = @transform_4, window_bounds = array<i64: 56, 1>}]} {
    %c0 = arith.constant 0 : index
    %0 = memref.load %arg1[%c0] : memref<1xf32, #tpu.memory_space<smem>>
    %cst = arith.constant 5.000000e-01 : f32
    %1 = arith.mulf %cst, %0 : f32
    %2 = arith.mulf %1, %0 : f32
    %c0_0 = arith.constant 0 : index
    %c0_1 = arith.constant 0 : index
    %3 = vector.load %arg2[%c0_0, %c0_1] : memref<56x1xf32, #tpu.memory_space<vmem>>, vector<56x1xf32>
    %c0_2 = arith.constant 0 : index
    %c0_3 = arith.constant 0 : index
    %4 = vector.load %arg3[%c0_2, %c0_3] : memref<56x50xf32, #tpu.memory_space<vmem>>, vector<56x50xf32>
    %c0_4 = arith.constant 0 : index
    %c0_5 = arith.constant 0 : index
    %5 = vector.load %arg4[%c0_4, %c0_5] : memref<56x50xf32, #tpu.memory_space<vmem>>, vector<56x50xf32>
    %6 = vector.broadcast %3 : vector<56x1xf32> to vector<56x50xf32>
    %7 = arith.subf %6, %4 : vector<56x50xf32>
    %8 = arith.mulf %7, %7 : vector<56x50xf32>
    %cst_6 = arith.constant 0.000000e+00 : f32
    %9 = vector.broadcast %cst_6 : f32 to vector<56x50xf32>
    %10 = arith.subf %9, %8 : vector<56x50xf32>
    %11 = vector.broadcast %2 : f32 to vector<56x50xf32>
    %12 = arith.mulf %10, %11 : vector<56x50xf32>
    %c56_i32 = arith.constant 56 : i32
    %13 = arith.muli %arg0, %c56_i32 : i32
    %14 = tpu.iota {dimensions = array<i32: 0>} : vector<56x50xi32>
    %15 = vector.broadcast %13 : i32 to vector<56x50xi32>
    %16 = arith.addi %15, %14 : vector<56x50xi32>
    %c50_i32 = arith.constant 50 : i32
    %17 = vector.broadcast %c50_i32 : i32 to vector<56x50xi32>
    %18 = arith.cmpi slt, %16, %17 : vector<56x50xi32>
    %cst_7 = arith.constant 0.000000e+00 : f32
    %19 = vector.broadcast %cst_7 : f32 to vector<56x50xf32>
    %20 = arith.select %18, %12, %19 : vector<56x50xi1>, vector<56x50xf32>
    %cst_8 = arith.constant 0.000000e+00 : f32
    %21 = vector.broadcast %cst_8 : f32 to vector<56x50xf32>
    %22 = arith.select %18, %5, %21 : vector<56x50xi1>, vector<56x50xf32>
    %cst_9 = arith.constant dense<0xFF800000> : vector<56xf32>
    %23 = vector.multi_reduction <maximumf>, %20, %cst_9 [1] : vector<56x50xf32> to vector<56xf32>
    %24 = vector.shape_cast %23 : vector<56xf32> to vector<56x1xf32>
    %25 = vector.broadcast %24 : vector<56x1xf32> to vector<56x50xf32>
    %26 = arith.subf %20, %25 : vector<56x50xf32>
    %27 = math.exp %26 : vector<56x50xf32>
    %28 = arith.mulf %27, %22 : vector<56x50xf32>
    %cst_10 = arith.constant dense<0.000000e+00> : vector<56xf32>
    %29 = vector.multi_reduction <add>, %28, %cst_10 [1] : vector<56x50xf32> to vector<56xf32>
    %30 = vector.shape_cast %29 : vector<56xf32> to vector<56x1xf32>
    %cst_11 = arith.constant dense<0.000000e+00> : vector<56xf32>
    %31 = vector.multi_reduction <add>, %27, %cst_11 [1] : vector<56x50xf32> to vector<56xf32>
    %32 = vector.shape_cast %31 : vector<56xf32> to vector<56x1xf32>
    %33 = tpu.reciprocal %32 : vector<56x1xf32> -> vector<56x1xf32>
    %34 = arith.mulf %30, %33 : vector<56x1xf32>
    %c0_12 = arith.constant 0 : index
    %c0_13 = arith.constant 0 : index
    %35 = vector.load %arg5[%c0_12, %c0_13] : memref<56x1xf32, #tpu.memory_space<vmem>>, vector<56x1xf32>
    tpu.vector_store %arg5[%c0_12, %c0_13], %34 {strides = array<i32>} : memref<56x1xf32, #tpu.memory_space<vmem>>, vector<56x1xf32>,
    return
  }
  func.func @transform_0(%arg0: i32) -> i32 {
    %c0_i32 = arith.constant 0 : i32
    %c0_i32_0 = arith.constant 0 : i32
    return %c0_i32 : i32
  }
  func.func @transform_1(%arg0: i32) -> (i32, i32) {
    %c0_i32 = arith.constant 0 : i32
    %c0_i32_0 = arith.constant 0 : i32
    return %arg0, %c0_i32 : i32, i32
  }
  func.func @transform_2(%arg0: i32) -> (i32, i32) {
    %c0_i32 = arith.constant 0 : i32
    %c0_i32_0 = arith.constant 0 : i32
    return %arg0, %c0_i32 : i32, i32
  }
  func.func @transform_3(%arg0: i32) -> (i32, i32) {
    %c0_i32 = arith.constant 0 : i32
    %c0_i32_0 = arith.constant 0 : i32
    return %arg0, %c0_i32 : i32, i32
  }
  func.func @transform_4(%arg0: i32) -> (i32, i32) {
    %c0_i32 = arith.constant 0 : i32
    %c0_i32_0 = arith.constant 0 : i32
    return %arg0, %c0_i32 : i32, i32
  }
}

</mosaic_0001>

<bundles_post_ra>
// kernel: tpu_custom_call.1
= control target key start
LH: loop header
LB: loop body
LE: loop exit
PB: predicated region body
PF: predicated region fallthrough
CT: control target
= control target key end

     0   :  { %10 = vsyncpa [#allocation4], 0  ;;  %s431_s18 = smov [#allocation3]   ;;  %s432_s20 = smov 128   ;;  %s659_s0 = inlined_call_operand.<no memory space> [shape: f32[1], index: 0, kind: input, shape index: {}]   ;;  %s660_s1 = inlined_call_operand.vmem [shape: f32[50,1], index: 1, kind: input, shape index: {}]   ;;  %s661_s2 = inlined_call_operand.vmem [shape: f32[50,50], index: 2, kind: input, shape index: {}]   ;;  %s662_s3 = inlined_call_operand.hbm [shape: f32[50,50], index: 3, kind: input, shape index: {}]   ;;  %s663_s4 = inlined_call_operand.vmem [shape: f32[50,1], index: 4, kind: output, shape index: {}]  }
   0x1   :  { %s21_s17 = sshll.u32 %s662_s3, 4  ;;  %s23_s19 = sshll.u32 %s431_s18, 4  ;;  %s22_s17 = int_to_ptr.hbm [resolvable:$true] %s21_s17  ;;  %s24_s19 = int_to_ptr.vmem [resolvable:$true] %s23_s19 }
   0x2   :  { %s433_s21 = smov 8  }
   0x3   :  { %29 = dma.hbm_to_vmem [thread:$0]  %s22_s17, 896, %s24_s19, [#allocation4], %s432_s20, %s432_s20, %s433_s21  }
   0x4   :  { %429 = dma.done.wait [#allocation4], 896  }
   0x5   :  { %430 = vsyncadd [#allocation4], 4294966400  ;;  %v434_v0 = vmov 0   ;;  %v43_v1 = vld [vmem:[%s660_s1 + $0x30] sm:$0xff]  ;;  %v38_v2 = vld [vmem:[%s660_s1 + $0x8] sm:$0xff]  ;;  %s35_s13 = smul.f32 0.5, %s659_s0  ;;  %v123_v27 = vlaneseq }
   0x6   :  { %375 = vset.pattern.permute.xlu1 %v434_v0  ;;  %374 = vset.pattern.permute.xlu0 %v434_v0  ;;  %v40_v3 = vld [vmem:[%s660_s1 + $0x18] sm:$0xff]  ;;  %v39_v4 = vld [vmem:[%s660_s1 + $0x10] sm:$0xff]  ;;  %v37_v5 = vld [vmem:[%s660_s1] sm:$0xff]  ;;  %vm160_vm0 = vcmask 408576   ;;  %vm357_vm6 = vcmask 7168  }
   0x7   :  { %376 = vset.pattern.permute.xlu2 %v434_v0  ;;  %90 = vperm.xlu0 %374, %v43_v1   ;;  %v41_v6 = vld [vmem:[%s660_s1 + $0x20] sm:$0xff]  ;;  %v42_v7 = vld [vmem:[%s660_s1 + $0x28] sm:$0xff]  ;;  %v47_v8 = vld [vmem:[%s661_s2 + $0x18] sm:$0xff]  ;;  %s36_s1 = smul.f32 %s35_s13, %s659_s0  ;;  %v124_v38 = vshrl.u32 %v123_v27, 7 }
   0x8   :  { %65 = vperm.xlu1 %375, %v38_v2   ;;  %75 = vperm.xlu2 %376, %v40_v3   ;;  %v45_v10 = vld [vmem:[%s661_s2 + $0x8] sm:$0xff]  ;;  %v50_v15 = vld [vmem:[%s661_s2 + $0x30] sm:$0xff]  ;;  %v44_v22 = vld [vmem:[%s661_s2] sm:$0xff] }
   0x9   :  { %v114_v18 = vstv %s36_s1  ;;  %v46_v21 = vld [vmem:[%s661_s2 + $0x10] sm:$0xff]  ;;  %v48_v24 = vld [vmem:[%s661_s2 + $0x20] sm:$0xff]  ;;  %v49_v43 = vld [vmem:[%s661_s2 + $0x28] sm:$0xff]  ;;  %v513_v47 = vadd.s32 48, %v124_v38 }
   0xb   :  { %vm145_vm1 = vcmp.lt.s32.totalorder %v513_v47, 50 }
   0xf   :  { %60 = vperm.xlu0 %374, %v37_v5  }
  0x10   :  { %70 = vperm.xlu1 %375, %v39_v4   ;;  %80 = vperm.xlu2 %376, %v41_v6  }
  0x17   :  { %85 = vperm.xlu0 %374, %v42_v7  }
  0x62   :  { %v76_v9 = vpop.permute.xlu2 %75 }
  0x63   :  { %v96_v11 = vsub.f32 %v76_v9, %v47_v8 }
  0x65   :  { %v103_v17 = vmul.f32 %v96_v11, %v96_v11 }
  0x67   :  { %v110_v23 = vsub.f32 0.0, %v103_v17 }
  0x69   :  { %v118_v37 = vmul.f32 %v114_v18, %v110_v23 }
  0x6a   :  { %v81_v25 = vpop.permute.xlu2 %80 }
  0x6b   :  { %v97_v34 = vsub.f32 %v81_v25, %v48_v24  ;;  %v170_v44 = vsel %vm160_vm0, %v118_v37, -inf }
  0x6d   :  { %v104_v42 = vmul.f32 %v97_v34, %v97_v34 }
  0x6f   :  { %v111_v52 = vsub.f32 0.0, %v104_v42 }
  0x71   :  { %v119_v57 = vmul.f32 %v114_v18, %v111_v52 }
  0x73   :  { %v173_v61 = vsel %vm160_vm0, %v119_v57, -inf }
  0x79   :  { %v91_v12 = vpop.permute.xlu0 %90 }
  0x7a   :  { %v66_v13 = vpop.permute.xlu1 %65  ;;  %v99_v20 = vsub.f32 %v91_v12, %v50_v15 }
  0x7b   :  { %v94_v14 = vsub.f32 %v66_v13, %v45_v10 }
  0x7c   :  { %v106_v33 = vmul.f32 %v99_v20, %v99_v20 }
  0x7d   :  { %v101_v16 = vmul.f32 %v94_v14, %v94_v14 }
  0x7e   :  { %v113_v41 = vsub.f32 0.0, %v106_v33 }
  0x7f   :  { %v108_v19 = vsub.f32 0.0, %v101_v16 }
  0x80   :  { %v121_v53 = vmul.f32 %v114_v18, %v113_v41  ;;  %v55_v41 = vld [vmem:[#allocation3 + $0x20] sm:$0xff] }
  0x81   :  { %v116_v26 = vmul.f32 %v114_v18, %v108_v19  ;;  %v61_v29 = vpop.permute.xlu0 %60 }
  0x82   :  { %v71_v28 = vpop.permute.xlu1 %70  ;;  %v93_v31 = vsub.f32 %v61_v29, %v44_v22  ;;  %v152_v56 = vsel %vm145_vm1, %v121_v53, 0.0 }
  0x83   :  { %v95_v30 = vsub.f32 %v71_v28, %v46_v21  ;;  %v164_v32 = vsel %vm160_vm0, %v116_v26, -inf  ;;  %v179_v59 = vsel %vm160_vm0, %v152_v56, -inf }
  0x84   :  { %165 = vmax.xlane.f32.xlu2 %v164_v32  ;;  %v100_v36 = vmul.f32 %v93_v31, %v93_v31  ;;  %v51_v31 = vld [vmem:[#allocation3] sm:$0xff]  ;;  %v52_v32 = vld [vmem:[#allocation3 + $0x8] sm:$0xff] }
  0x85   :  { %v102_v35 = vmul.f32 %v95_v30, %v95_v30 }
  0x86   :  { %v107_v40 = vsub.f32 0.0, %v100_v36 }
  0x87   :  { %v109_v39 = vsub.f32 0.0, %v102_v35 }
  0x88   :  { %v115_v46 = vmul.f32 %v114_v18, %v107_v40  ;;  %v53_v40 = vld [vmem:[#allocation3 + $0x10] sm:$0xff] }
  0x89   :  { %v117_v45 = vmul.f32 %v114_v18, %v109_v39  ;;  %v86_v48 = vpop.permute.xlu0 %85  ;;  %v54_v39 = vld [vmem:[#allocation3 + $0x18] sm:$0xff] }
  0x8a   :  { %v98_v49 = vsub.f32 %v86_v48, %v49_v43  ;;  %v161_v51 = vsel %vm160_vm0, %v115_v46, -inf }
  0x8b   :  { %v167_v50 = vsel %vm160_vm0, %v117_v45, -inf  ;;  %162 = vmax.xlane.f32.xlu1 %v161_v51 }
  0x8c   :  { %171 = vmax.xlane.f32.xlu2 %v170_v44  ;;  %168 = vmax.xlane.f32.xlu0 %v167_v50  ;;  %v105_v54 = vmul.f32 %v98_v49, %v98_v49  ;;  %v56_v50 = vld [vmem:[#allocation3 + $0x28] sm:$0xff] }
  0x8e   :  { %v112_v55 = vsub.f32 0.0, %v105_v54 }
  0x90   :  { %v120_v58 = vmul.f32 %v114_v18, %v112_v55 }
  0x92   :  { %v176_v60 = vsel %vm160_vm0, %v120_v58, -inf }
  0x93   :  { %174 = vmax.xlane.f32.xlu1 %v173_v61 }
  0x94   :  { %180 = vmax.xlane.f32.xlu0 %v179_v59  ;;  %177 = vmax.xlane.f32.xlu2 %v176_v60 }
  0xf7   :  { %v166_v62 = vpop.xlane.xlu2 %165 }
  0xf8   :  { %v183_v63 = vsub.f32 %v116_v26, %v166_v62 }
  0xfa   :  { %v191_v0 = vmul.f32 1.442695, %v183_v63 }
  0xfc   :  { %377 = vpow2.f32 %v191_v0 }
  0xfe   :  { %v163_v3 = vpop.xlane.xlu1 %162 }
  0xff   :  { %v172_v1 = vpop.xlane.xlu2 %171  ;;  %v169_v2 = vpop.xlane.xlu0 %168  ;;  %v182_v5 = vsub.f32 %v115_v46, %v163_v3 }
 0x100   :  { %v184_v4 = vsub.f32 %v117_v45, %v169_v2  ;;  %v185_v8 = vsub.f32 %v118_v37, %v172_v1  ;;  %v57_v45 = vld [vmem:[#allocation3 + $0x30] sm:$0xff] }
 0x101   :  { %v189_v9 = vmul.f32 1.442695, %v182_v5  ;;  %v159_v51 = vsel %vm145_vm1, %v57_v45, 0.0 }
 0x102   :  { %v378_v6 = vpop.eup %377  ;;  %v193_v7 = vmul.f32 1.442695, %v184_v4  ;;  %v195_v11 = vmul.f32 1.442695, %v185_v8 }
 0x103   :  { %v234_v10 = vsel %vm160_vm0, %v378_v6, 0.0  ;;  %379 = vpow2.f32 %v189_v9  ;;  %v204_v35 = vmul.f32 %v378_v6, %v52_v32 }
 0x104   :  { %235 = vadd.xlane.f32.xlu2 %v234_v10  ;;  %381 = vpow2.f32 %v193_v7 }
 0x105   :  { %383 = vpow2.f32 %v195_v11  ;;  %v213_v38 = vsel %vm160_vm0, %v204_v35, 0.0 }
 0x106   :  { %v175_v13 = vpop.xlane.xlu1 %174 }
 0x107   :  { %v178_v12 = vpop.xlane.xlu2 %177  ;;  %v181_v15 = vpop.xlane.xlu0 %180  ;;  %v186_v16 = vsub.f32 %v119_v57, %v175_v13 }
 0x108   :  { %v187_v14 = vsub.f32 %v120_v58, %v178_v12  ;;  %v188_v20 = vsub.f32 %v152_v56, %v181_v15 }
 0x109   :  { %v380_v18 = vpop.eup %379  ;;  %v197_v19 = vmul.f32 1.442695, %v186_v16 }
 0x10a   :  { %v199_v17 = vmul.f32 1.442695, %v187_v14  ;;  %v382_v21 = vpop.eup %381  ;;  %v231_v22 = vsel %vm160_vm0, %v380_v18, 0.0  ;;  %v201_v24 = vmul.f32 1.442695, %v188_v20  ;;  %v203_v33 = vmul.f32 %v380_v18, %v51_v31 }
 0x10b   :  { %232 = vadd.xlane.f32.xlu1 %v231_v22  ;;  %v237_v23 = vsel %vm160_vm0, %v382_v21, 0.0  ;;  %v384_v25 = vpop.eup %383  ;;  %v205_v43 = vmul.f32 %v382_v21, %v53_v40 }
 0x10c   :  { %385 = vpow2.f32 %v199_v17  ;;  %238 = vadd.xlane.f32.xlu0 %v237_v23  ;;  %v240_v29 = vsel %vm160_vm0, %v384_v25, 0.0  ;;  %v210_v36 = vsel %vm160_vm0, %v203_v33, 0.0  ;;  %v206_v42 = vmul.f32 %v384_v25, %v54_v39 }
 0x10d   :  { %387 = vpow2.f32 %v197_v19  ;;  %v216_v48 = vsel %vm160_vm0, %v205_v43, 0.0 }
 0x10e   :  { %389 = vpow2.f32 %v201_v24  ;;  %v219_v46 = vsel %vm160_vm0, %v206_v42, 0.0 }
 0x112   :  { %v386_v26 = vpop.eup %385 }
 0x113   :  { %v388_v27 = vpop.eup %387  ;;  %v246_v28 = vsel %vm160_vm0, %v386_v26, 0.0  ;;  %241 = vadd.xlane.f32.xlu1 %v240_v29  ;;  %v208_v52 = vmul.f32 %v386_v26, %v56_v50 }
 0x114   :  { %v243_v30 = vsel %vm160_vm0, %v388_v27, 0.0  ;;  %247 = vadd.xlane.f32.xlu0 %v246_v28  ;;  %v390_v34 = vpop.eup %389  ;;  %v207_v44 = vmul.f32 %v388_v27, %v55_v41 }
 0x115   :  { %244 = vadd.xlane.f32.xlu2 %v243_v30  ;;  %v249_v37 = vsel %vm160_vm0, %v390_v34, 0.0  ;;  %v209_v53 = vmul.f32 %v390_v34, %v159_v51  ;;  %v225_v54 = vsel %vm160_vm0, %v208_v52, 0.0 }
 0x116   :  { %v222_v49 = vsel %vm160_vm0, %v207_v44, 0.0 }
 0x117   :  { %v228_v55 = vsel %vm160_vm0, %v209_v53, 0.0 }
 0x11b   :  { %250 = vadd.xlane.f32.xlu1 %v249_v37 }
 0x11c   :  { %214 = vadd.xlane.f32.xlu0 %v213_v38 }
 0x11d   :  { %211 = vadd.xlane.f32.xlu2 %v210_v36 }
 0x123   :  { %217 = vadd.xlane.f32.xlu1 %v216_v48 }
 0x124   :  { %223 = vadd.xlane.f32.xlu0 %v222_v49 }
 0x125   :  { %220 = vadd.xlane.f32.xlu2 %v219_v46 }
 0x12b   :  { %226 = vadd.xlane.f32.xlu1 %v225_v54 }
 0x12d   :  { %229 = vadd.xlane.f32.xlu2 %v228_v55 }
 0x177   :  { %v236_v56 = vpop.xlane.xlu2 %235 }
 0x178   :  { %391 = vrcp.f32 %v236_v56  ;;  %v275_v6 = vand.u32 2147483647, %v236_v56  ;;  %v277_v7 = vand.u32 2147483648, %v236_v56  ;;  %vm271_vm3 = vweird.f32 %v236_v56 }
 0x17a   :  { %vm276_vm7 = vcmp.eq.f32.partialorder %v275_v6, 8.507059e+37  ;;  %v278_v16 = vor.u32 1.1754944e-38, %v277_v7 }
 0x17e   :  { %v392_v57 = vpop.eup %391  ;;  %v233_v59 = vpop.xlane.xlu1 %232 }
 0x17f   :  { %v267_v58 = vmul.f32 %v392_v57, %v236_v56  ;;  %393 = vrcp.f32 %v233_v59  ;;  %v539_v61 = vpop.xlane.xlu0 %238  ;;  %vm272_vm2 = vweird.f32 %v392_v57  ;;  %v261_v9 = vand.u32 2147483647, %v233_v59 }
 0x180   :  { %395 = vrcp.f32 %v539_v61  ;;  %v263_v11 = vand.u32 2147483648, %v233_v59  ;;  %vm555_vm4 = vmor %vm271_vm3, %vm272_vm2  ;;  %v289_v13 = vand.u32 2147483647, %v539_v61  ;;  %vm257_vm8 = vweird.f32 %v233_v59 }
 0x181   :  { %v268_v60 = vsub.f32 1.0, %v267_v58  ;;  %vm563_vm9 = vcmp.eq.f32.partialorder %v261_v9, 8.507059e+37  ;;  %vm285_vm10 = vweird.f32 %v539_v61  ;;  %v291_v24 = vand.u32 2147483648, %v539_v61 }
 0x182   :  { %v264_v21 = vor.u32 1.1754944e-38, %v263_v11  ;;  %vm568_vm12 = vcmp.eq.f32.partialorder %v289_v13, 8.507059e+37 }
 0x183   :  { %v269_v47 = vmul.f32 %v392_v57, %v268_v60  ;;  %v292_v48 = vor.u32 1.1754944e-38, %v291_v24 }
 0x185   :  { %v394_v62 = vpop.eup %393  ;;  %v270_v3 = vadd.f32 %v392_v57, %v269_v47 }
 0x186   :  { %v542_v63 = vpop.eup %395  ;;  %v253_v0 = vmul.f32 %v394_v62, %v233_v59  ;;  %v544_v1 = vpop.xlane.xlu1 %241  ;;  %vm258_vm5 = vweird.f32 %v394_v62 }
 0x187   :  { %v281_v4 = vmul.f32 %v542_v63, %v539_v61  ;;  %397 = vrcp.f32 %v544_v1  ;;  %v551_v5 = vpop.xlane.xlu0 %247  ;;  %v274_v15 = vsel %vm555_vm4, %v392_v57, %v270_v3  ;;  %vm259_vm11 = vmor %vm257_vm8, %vm258_vm5  ;;  %v303_v30 = vand.u32 2147483647, %v544_v1 }
 0x188   :  { %v546_v2 = vpop.xlane.xlu2 %244  ;;  %v254_v8 = vsub.f32 1.0, %v253_v0  ;;  %v279_v22 = vsel %vm276_vm7, %v278_v16, %v274_v15  ;;  %vm286_vm13 = vweird.f32 %v542_v63  ;;  %v305_v41 = vand.u32 2147483648, %v544_v1 }
 0x189   :  { %399 = vrcp.f32 %v546_v2  ;;  %v282_v10 = vsub.f32 1.0, %v281_v4  ;;  %v317_v42 = vand.u32 2147483647, %v546_v2  ;;  %v319_v43 = vand.u32 2147483648, %v546_v2  ;;  %vm598_vm15 = vmor %vm285_vm10, %vm286_vm13 }
 0x18a   :  { %401 = vrcp.f32 %v551_v5  ;;  %v255_v14 = vmul.f32 %v394_v62, %v254_v8  ;;  %vm299_vm0 = vweird.f32 %v544_v1  ;;  %vm610_vm2 = vcmp.eq.f32.partialorder %v303_v30, 8.507059e+37 }
 0x18b   :  { %v283_v17 = vmul.f32 %v542_v63, %v282_v10  ;;  %vm313_vm3 = vweird.f32 %v546_v2  ;;  %v306_v55 = vor.u32 1.1754944e-38, %v305_v41  ;;  %vm616_vm5 = vcmp.eq.f32.partialorder %v317_v42, 8.507059e+37 }
 0x18c   :  { %v256_v18 = vadd.f32 %v394_v62, %v255_v14  ;;  %v320_v58 = vor.u32 1.1754944e-38, %v319_v43  ;;  %v333_v8 = vand.u32 2147483648, %v551_v5  ;;  %v331_v10 = vand.u32 2147483647, %v551_v5 }
 0x18d   :  { %v398_v20 = vpop.eup %397  ;;  %v284_v35 = vadd.f32 %v542_v63, %v283_v17 }
 0x18e   :  { %v295_v26 = vmul.f32 %v398_v20, %v544_v1  ;;  %v260_v27 = vsel %vm259_vm11, %v394_v62, %v256_v18  ;;  %v574_v29 = vpop.xlane.xlu1 %250  ;;  %vm300_vm14 = vweird.f32 %v398_v20  ;;  %v334_v14 = vor.u32 1.1754944e-38, %v333_v8 }
 0x18f   :  { %v400_v25 = vpop.eup %399  ;;  %v265_v33 = vsel %vm563_vm9, %v264_v21, %v260_v27  ;;  %403 = vrcp.f32 %v574_v29  ;;  %v215_v34 = vpop.xlane.xlu0 %214  ;;  %v288_v49 = vsel %vm598_vm15, %v542_v63, %v284_v35  ;;  %vm301_vm4 = vmor %vm299_vm0, %vm300_vm14  ;;  %vm327_vm9 = vweird.f32 %v551_v5 }
 0x190   :  { %v212_v28 = vpop.xlane.xlu2 %211  ;;  %v578_v31 = vpop.eup %401  ;;  %v309_v32 = vmul.f32 %v400_v25, %v546_v2  ;;  %v296_v36 = vsub.f32 1.0, %v295_v26  ;;  %v351_v39 = vmul.f32 %v279_v22, %v215_v34  ;;  %vm314_vm1 = vweird.f32 %v400_v25 }
 0x191   :  { %v323_v37 = vmul.f32 %v578_v31, %v551_v5  ;;  %v350_v38 = vmul.f32 %v265_v33, %v212_v28  ;;  %v293_v62 = vsel %vm568_vm12, %v292_v48, %v288_v49  ;;  %vm315_vm7 = vmor %vm313_vm3, %vm314_vm1  ;;  %vm328_vm8 = vweird.f32 %v578_v31 }
 0x192   :  { %v310_v40 = vsub.f32 1.0, %v309_v32  ;;  %v297_v45 = vmul.f32 %v398_v20, %v296_v36  ;;  %359 = vst.msk [vmem:[%s663_s4 + $0x8] sm:$0xff] %vm357_vm6, %v351_v39  ;;  %v347_v11 = vand.u32 2147483648, %v574_v29  ;;  %vm329_vm10 = vmor %vm327_vm9, %vm328_vm8  ;;  %v345_v13 = vand.u32 2147483647, %v574_v29 }
 0x193   :  { %v324_v44 = vsub.f32 1.0, %v323_v37  ;;  %358 = vst.msk [vmem:[%s663_s4] sm:$0xff] %vm357_vm6, %v350_v38  ;;  %vm341_vm12 = vweird.f32 %v574_v29  ;;  %vm332_vm13 = vcmp.eq.f32.partialorder %v331_v10, 8.507059e+37 }
 0x194   :  { %v311_v50 = vmul.f32 %v400_v25, %v310_v40  ;;  %v298_v51 = vadd.f32 %v398_v20, %v297_v45  ;;  %v348_v16 = vor.u32 1.1754944e-38, %v347_v11  ;;  %vm346_vm15 = vcmp.eq.f32.partialorder %v345_v13, 8.507059e+37 }
 0x195   :  { %v325_v53 = vmul.f32 %v578_v31, %v324_v44  ;;  %v404_v54 = vpop.eup %403 }
 0x196   :  { %v312_v56 = vadd.f32 %v400_v25, %v311_v50  ;;  %v337_v59 = vmul.f32 %v404_v54, %v574_v29  ;;  %v302_v60 = vsel %vm301_vm4, %v398_v20, %v298_v51  ;;  %v218_v47 = vpop.xlane.xlu1 %217  ;;  %vm342_vm11 = vweird.f32 %v404_v54 }
 0x197   :  { %v307_v63 = vsel %vm610_vm2, %v306_v55, %v302_v60  ;;  %v352_v0 = vmul.f32 %v293_v62, %v218_v47  ;;  %v224_v2 = vpop.xlane.xlu0 %223  ;;  %v326_v3 = vadd.f32 %v578_v31, %v325_v53  ;;  %vm343_vm14 = vmor %vm341_vm12, %vm342_vm11 }
 0x198   :  { %v221_v61 = vpop.xlane.xlu2 %220  ;;  %v316_v1 = vsel %vm315_vm7, %v400_v25, %v312_v56  ;;  %v338_v4 = vsub.f32 1.0, %v337_v59 }
 0x199   :  { %v353_v6 = vmul.f32 %v307_v63, %v221_v61  ;;  %v321_v7 = vsel %vm616_vm5, %v320_v58, %v316_v1  ;;  %360 = vst.msk [vmem:[%s663_s4 + $0x10] sm:$0xff] %vm357_vm6, %v352_v0  ;;  %v330_v5 = vsel %vm329_vm10, %v578_v31, %v326_v3 }
 0x19a   :  { %v354_v9 = vmul.f32 %v321_v7, %v224_v2  ;;  %v339_v12 = vmul.f32 %v404_v54, %v338_v4  ;;  %v335_v18 = vsel %vm332_vm13, %v334_v14, %v330_v5 }
 0x19b   :  { %361 = vst.msk [vmem:[%s663_s4 + $0x18] sm:$0xff] %vm357_vm6, %v353_v6 }
 0x19c   :  { %362 = vst.msk [vmem:[%s663_s4 + $0x20] sm:$0xff] %vm357_vm6, %v354_v9  ;;  %v340_v15 = vadd.f32 %v404_v54, %v339_v12 }
 0x19e   :  { %v227_v17 = vpop.xlane.xlu1 %226  ;;  %v344_v19 = vsel %vm343_vm14, %v404_v54, %v340_v15 }
 0x19f   :  { %v355_v21 = vmul.f32 %v335_v18, %v227_v17  ;;  %v349_v22 = vsel %vm346_vm15, %v348_v16, %v344_v19 }
 0x1a0   :  { %v230_v20 = vpop.xlane.xlu2 %229 }
 0x1a1   :  { %v356_v23 = vmul.f32 %v349_v22, %v230_v20  ;;  %363 = vst.msk [vmem:[%s663_s4 + $0x28] sm:$0xff] %vm357_vm6, %v355_v21 }
 0x1a3   :  { %364 = vst.msk [vmem:[%s663_s4 + $0x30] sm:$0xff] %vm357_vm6, %v356_v23 }
 0x1a4   :  { %369 = vsyncpa [#allocation4], 1 }

</bundles_post_ra>
